<compile_context>
chip_gen: v5e
topology: v5e:2x2
jax: 0.10.0
libtpu: 0.0.40
codegen_flags: <defaults>
</compile_context>

<pallas_src>
import functools

import jax
import jax.numpy as jnp
from jax import lax
from jax.experimental import pallas as pl
from jax.experimental.pallas import tpu as pltpu

_INV_SQRT2 = 0.7071067811865476


def _gelu_exact(x):
    return 0.5 * x * (1.0 + lax.erf(x * _INV_SQRT2))


def encoder_kernel(x_ref, prev_ref, wqkv_ref, wo_ref, w1_ref, w2_ref,
                   pvec_ref, b1_ref, out_ref, scores_ref, *, num_heads):
    eps = 1e-5
    x = x_ref[...]                                   # (B, P, D) f32
    B, P, D = x.shape
    H = num_heads
    nd = D // H
    scale = float(nd) ** -0.5
    n = B * P
    inv_n = 1.0 / float(n)

    # packed per-channel vectors: rows = bq,bk,bv,bo,b2,g_attn,be_attn,g_ffn,be_ffn
    pv = pvec_ref[...]                               # (9, D)
    bq, bk, bv = pv[0:1], pv[1:2], pv[2:3]
    bo, b2 = pv[3:4], pv[4:5]
    g_attn, be_attn = pv[5:6], pv[6:7]
    g_ffn, be_ffn = pv[7:8], pv[8:9]

    x2 = x.reshape(n, D)

    # ---- pre-norm BatchNorm1d #1 (batch stats over B*P rows, per channel D) ----
    mean = jnp.sum(x2, axis=0, keepdims=True) * inv_n
    msq = jnp.sum(x2 * x2, axis=0, keepdims=True) * inv_n
    var = msq - mean * mean                          # one-pass (biased) variance
    sc1 = lax.rsqrt(var + eps) * g_attn
    xn = x2 * sc1 + (be_attn - mean * sc1)           # (n, D)

    # ---- fused Q/K/V projection: a single MXU matmul ----
    qkv = jnp.dot(xn, wqkv_ref[...], preferred_element_type=jnp.float32)  # (n, 3D)
    q2 = qkv[:, 0 * D:1 * D] + bq
    k2 = qkv[:, 1 * D:2 * D] + bk
    v2 = qkv[:, 2 * D:3 * D] + bv

    # rearrange (n, D) -> (B*H, P, nd), batch index z = b*H + h
    def to_heads(t2):
        t3 = t2.reshape(B, P, D)
        parts = [t3[:, :, h * nd:(h + 1) * nd] for h in range(H)]   # (B, P, nd) each
        return jnp.stack(parts, axis=1).reshape(B * H, P, nd)

    qh, kh, vh = to_heads(q2), to_heads(k2), to_heads(v2)

    # ---- all heads at once: one batched score matmul, one softmax, one PV matmul ----
    prev = prev_ref[...].reshape(B * H, P, P)
    s = jnp.einsum('zpe,zqe->zpq', qh, kh,
                   preferred_element_type=jnp.float32) * scale + prev
    scores_ref[...] = s.reshape(B, H, P, P)          # single dense store (pre-softmax)
    w = jax.nn.softmax(s, axis=-1)
    o = jnp.einsum('zpq,zqe->zpe', w, vh,
                   preferred_element_type=jnp.float32)               # (B*H, P, nd)

    # back to (n, D) and output projection
    o4 = o.reshape(B, H, P, nd)
    attn = jnp.concatenate([o4[:, h] for h in range(H)], axis=-1)    # (B, P, D)
    attn = attn.reshape(n, D)
    attn = jnp.dot(attn, wo_ref[...], preferred_element_type=jnp.float32) + bo

    # residual (dropout_rate == 0 -> identity); residual uses normalized x, as in the
    # PyTorch module (x was overwritten by norm_attn before attention).
    y = xn + attn

    # ---- pre-norm BatchNorm1d #2 ----
    mean2 = jnp.sum(y, axis=0, keepdims=True) * inv_n
    msq2 = jnp.sum(y * y, axis=0, keepdims=True) * inv_n
    var2 = msq2 - mean2 * mean2
    sc2 = lax.rsqrt(var2 + eps) * g_ffn
    yn = y * sc2 + (be_ffn - mean2 * sc2)

    # ---- feed forward ----
    h1 = jnp.dot(yn, w1_ref[...], preferred_element_type=jnp.float32) + b1_ref[...]
    h1 = _gelu_exact(h1)
    h2 = jnp.dot(h1, w2_ref[...], preferred_element_type=jnp.float32) + b2

    out_ref[...] = (yn + h2).reshape(B, P, D)


def encoder_forward(x, prev, params, num_heads):
    B, P, D = x.shape
    H = num_heads
    # host-side packing (layout plumbing, done once per call by XLA)
    wqkv = jnp.concatenate([params['wq'], params['wk'], params['wv']], axis=1)  # (D, 3D)
    pvec = jnp.concatenate([params['bq'], params['bk'], params['bv'],
                            params['bo'], params['b2'],
                            params['g_attn'], params['be_attn'],
                            params['g_ffn'], params['be_ffn']], axis=0)         # (9, D)
    args = (x, prev, wqkv, params['wo'], params['w1'], params['w2'],
            pvec, params['b1'])
    vmem = pl.BlockSpec(memory_space=pltpu.MemorySpace.VMEM)
    out_shape = (jax.ShapeDtypeStruct((B, P, D), jnp.float32),
                 jax.ShapeDtypeStruct((B, H, P, P), jnp.float32))
    kernel = functools.partial(encoder_kernel, num_heads=num_heads)
    return pl.pallas_call(
        kernel,
        out_shape=out_shape,
        in_specs=[vmem] * len(args),
        out_specs=(vmem, vmem),
    )(*args)


# ---------------- pure-JAX reference (same math) for validation ----------------
def encoder_reference(x, prev, params, num_heads):
    eps = 1e-5
    B, P, D = x.shape
    H = num_heads
    nd = D // H
    scale = float(nd) ** -0.5

    def bn(z, g, b):
        z2 = z.reshape(B * P, D)
        m = jnp.mean(z2, axis=0, keepdims=True)
        v = jnp.mean((z2 - m) ** 2, axis=0, keepdims=True)
        return ((z2 - m) / jnp.sqrt(v + eps) * g + b).reshape(B, P, D)

    xn = bn(x, params['g_attn'], params['be_attn'])
    q = xn @ params['wq'] + params['bq']
    k = xn @ params['wk'] + params['bk']
    v = xn @ params['wv'] + params['bv']
    q = q.reshape(B, P, H, nd).transpose(0, 2, 1, 3)
    k = k.reshape(B, P, H, nd).transpose(0, 2, 1, 3)
    v = v.reshape(B, P, H, nd).transpose(0, 2, 1, 3)
    scores = jnp.einsum('bhpd,bhqd->bhpq', q, k) * scale + prev
    w = jax.nn.softmax(scores, axis=-1)
    o = jnp.einsum('bhpq,bhqd->bhpd', w, v).transpose(0, 2, 1, 3).reshape(B, P, D)
    o = o @ params['wo'] + params['bo']
    y = xn + o
    yn = bn(y, params['g_ffn'], params['be_ffn'])
    h1 = jax.nn.gelu(yn @ params['w1'] + params['b1'], approximate=False)
    h2 = h1 @ params['w2'] + params['b2']
    return yn + h2, scores


def init_params(key, d_model, d_ff):
    ks = jax.random.split(key, 6)
    s = 0.02
    f32 = jnp.float32
    return {
        'wq': jax.random.normal(ks[0], (d_model, d_model), f32) * s,
        'wk': jax.random.normal(ks[1], (d_model, d_model), f32) * s,
        'wv': jax.random.normal(ks[2], (d_model, d_model), f32) * s,
        'wo': jax.random.normal(ks[3], (d_model, d_model), f32) * s,
        'w1': jax.random.normal(ks[4], (d_model, d_ff), f32) * s,
        'w2': jax.random.normal(ks[5], (d_ff, d_model), f32) * s,
        'bq': jnp.zeros((1, d_model), f32),
        'bk': jnp.zeros((1, d_model), f32),
        'bv': jnp.zeros((1, d_model), f32),
        'bo': jnp.zeros((1, d_model), f32),
        'b1': jnp.zeros((1, d_ff), f32),
        'b2': jnp.zeros((1, d_model), f32),
        # BatchNorm1d defaults: weight=1, bias=0
        'g_attn': jnp.ones((1, d_model), f32),
        'be_attn': jnp.zeros((1, d_model), f32),
        'g_ffn': jnp.ones((1, d_model), f32),
        'be_ffn': jnp.zeros((1, d_model), f32),
    }


if __name__ == "__main__":
    # args: patch_num=8, num_heads=4, d_model=32, d_ff=64, dropout_rate=0.0
    B, P, D, H, F = 2, 8, 32, 4, 64

    key = jax.random.PRNGKey(0)
    kx, kp, kw = jax.random.split(key, 3)
    x = jax.random.normal(kx, (B, P, D), jnp.float32)
    prev = jax.random.normal(kp, (B, H, P, P), jnp.float32) * 0.1
    params = init_params(kw, D, F)

    out, scores = encoder_forward(x, prev, params, num_heads=H)
    out = jax.block_until_ready(out)
    scores = jax.block_until_ready(scores)

    ref_out, ref_scores = encoder_reference(x, prev, params, num_heads=H)
    assert out.shape == (B, P, D) and scores.shape == (B, H, P, P)
    assert jnp.allclose(out, ref_out, atol=1e-4, rtol=1e-4)
    assert jnp.allclose(scores, ref_scores, atol=1e-4, rtol=1e-4)

    print("KERNEL_OK")
</pallas_src>

<mosaic_0001>
module attributes {stable_mosaic.version = 11 : i64} {
  func.func @encoder_kernel(%arg0: memref<2x8x32xf32, #tpu.memory_space<vmem>>, %arg1: memref<2x4x8x8xf32, #tpu.memory_space<vmem>>, %arg2: memref<32x96xf32, #tpu.memory_space<vmem>>, %arg3: memref<32x32xf32, #tpu.memory_space<vmem>>, %arg4: memref<32x64xf32, #tpu.memory_space<vmem>>, %arg5: memref<64x32xf32, #tpu.memory_space<vmem>>, %arg6: memref<9x32xf32, #tpu.memory_space<vmem>>, %arg7: memref<1x64xf32, #tpu.memory_space<vmem>>, %arg8: memref<2x8x32xf32, #tpu.memory_space<vmem>>, %arg9: memref<2x4x8x8xf32, #tpu.memory_space<vmem>>) attributes {dimension_semantics = [], scalar_prefetch = 0 : i64, scratch_operands = 0 : i64, tpu.core_type = #tpu.core_type<tc>} {
    %c0 = arith.constant 0 : index
    %c0_0 = arith.constant 0 : index
    %c0_1 = arith.constant 0 : index
    %0 = vector.load %arg0[%c0, %c0_0, %c0_1] : memref<2x8x32xf32, #tpu.memory_space<vmem>>, vector<2x8x32xf32>
    %c0_2 = arith.constant 0 : index
    %c0_3 = arith.constant 0 : index
    %1 = vector.load %arg6[%c0_2, %c0_3] : memref<9x32xf32, #tpu.memory_space<vmem>>, vector<9x32xf32>
    %2 = vector.extract_strided_slice %1 {offsets = [0, 0], sizes = [1, 32], strides = [1, 1]} : vector<9x32xf32> to vector<1x32xf32>
    %3 = vector.extract_strided_slice %1 {offsets = [1, 0], sizes = [1, 32], strides = [1, 1]} : vector<9x32xf32> to vector<1x32xf32>
    %4 = vector.extract_strided_slice %1 {offsets = [2, 0], sizes = [1, 32], strides = [1, 1]} : vector<9x32xf32> to vector<1x32xf32>
    %5 = vector.extract_strided_slice %1 {offsets = [3, 0], sizes = [1, 32], strides = [1, 1]} : vector<9x32xf32> to vector<1x32xf32>
    %6 = vector.extract_strided_slice %1 {offsets = [4, 0], sizes = [1, 32], strides = [1, 1]} : vector<9x32xf32> to vector<1x32xf32>
    %7 = vector.extract_strided_slice %1 {offsets = [5, 0], sizes = [1, 32], strides = [1, 1]} : vector<9x32xf32> to vector<1x32xf32>
    %8 = vector.extract_strided_slice %1 {offsets = [6, 0], sizes = [1, 32], strides = [1, 1]} : vector<9x32xf32> to vector<1x32xf32>
    %9 = vector.extract_strided_slice %1 {offsets = [7, 0], sizes = [1, 32], strides = [1, 1]} : vector<9x32xf32> to vector<1x32xf32>
    %10 = vector.extract_strided_slice %1 {offsets = [8, 0], sizes = [1, 32], strides = [1, 1]} : vector<9x32xf32> to vector<1x32xf32>
    %11 = vector.shape_cast %0 : vector<2x8x32xf32> to vector<16x32xf32>
    %cst = arith.constant dense<0.000000e+00> : vector<32xf32>
    %12 = vector.multi_reduction <add>, %11, %cst [0] : vector<16x32xf32> to vector<32xf32>
    %13 = vector.shape_cast %12 : vector<32xf32> to vector<1x32xf32>
    %cst_4 = arith.constant 6.250000e-02 : f32
    %14 = vector.broadcast %cst_4 : f32 to vector<1x32xf32>
    %15 = arith.mulf %13, %14 : vector<1x32xf32>
    %16 = arith.mulf %11, %11 : vector<16x32xf32>
    %cst_5 = arith.constant dense<0.000000e+00> : vector<32xf32>
    %17 = vector.multi_reduction <add>, %16, %cst_5 [0] : vector<16x32xf32> to vector<32xf32>
    %18 = vector.shape_cast %17 : vector<32xf32> to vector<1x32xf32>
    %cst_6 = arith.constant 6.250000e-02 : f32
    %19 = vector.broadcast %cst_6 : f32 to vector<1x32xf32>
    %20 = arith.mulf %18, %19 : vector<1x32xf32>
    %21 = arith.mulf %15, %15 : vector<1x32xf32>
    %22 = arith.subf %20, %21 : vector<1x32xf32>
    %cst_7 = arith.constant 9.99999974E-6 : f32
    %23 = vector.broadcast %cst_7 : f32 to vector<1x32xf32>
    %24 = arith.addf %22, %23 : vector<1x32xf32>
    %25 = math.rsqrt %24 : vector<1x32xf32>
    %26 = arith.mulf %25, %7 : vector<1x32xf32>
    %27 = vector.broadcast %26 : vector<1x32xf32> to vector<16x32xf32>
    %28 = arith.mulf %11, %27 : vector<16x32xf32>
    %29 = arith.mulf %15, %26 : vector<1x32xf32>
    %30 = arith.subf %8, %29 : vector<1x32xf32>
    %31 = vector.broadcast %30 : vector<1x32xf32> to vector<16x32xf32>
    %32 = arith.addf %28, %31 : vector<16x32xf32>
    %c0_8 = arith.constant 0 : index
    %c0_9 = arith.constant 0 : index
    %33 = vector.load %arg2[%c0_8, %c0_9] : memref<32x96xf32, #tpu.memory_space<vmem>>, vector<32x96xf32>
    %cst_10 = arith.constant dense<0.000000e+00> : vector<16x96xf32>
    %34 = tpu.matmul %32, %33, %cst_10 {dimension_numbers = #tpu.dot_dimension_numbers<[1], [0], [0], [1], [0, 0, 1, 1], [], []>} : vector<16x32xf32>, vector<32x96xf32>, vector<16x96xf32> -> vector<16x96xf32>
    %35 = vector.extract_strided_slice %34 {offsets = [0, 0], sizes = [16, 32], strides = [1, 1]} : vector<16x96xf32> to vector<16x32xf32>
    %36 = vector.broadcast %2 : vector<1x32xf32> to vector<16x32xf32>
    %37 = arith.addf %35, %36 : vector<16x32xf32>
    %38 = vector.extract_strided_slice %34 {offsets = [0, 32], sizes = [16, 32], strides = [1, 1]} : vector<16x96xf32> to vector<16x32xf32>
    %39 = vector.broadcast %3 : vector<1x32xf32> to vector<16x32xf32>
    %40 = arith.addf %38, %39 : vector<16x32xf32>
    %41 = vector.extract_strided_slice %34 {offsets = [0, 64], sizes = [16, 32], strides = [1, 1]} : vector<16x96xf32> to vector<16x32xf32>
    %42 = vector.broadcast %4 : vector<1x32xf32> to vector<16x32xf32>
    %43 = arith.addf %41, %42 : vector<16x32xf32>
    %44 = vector.shape_cast %37 : vector<16x32xf32> to vector<2x8x32xf32>
    %45 = vector.extract_strided_slice %44 {offsets = [0, 0, 0], sizes = [2, 8, 8], strides = [1, 1, 1]} : vector<2x8x32xf32> to vector<2x8x8xf32>
    %46 = vector.extract_strided_slice %44 {offsets = [0, 0, 8], sizes = [2, 8, 8], strides = [1, 1, 1]} : vector<2x8x32xf32> to vector<2x8x8xf32>
    %47 = vector.extract_strided_slice %44 {offsets = [0, 0, 16], sizes = [2, 8, 8], strides = [1, 1, 1]} : vector<2x8x32xf32> to vector<2x8x8xf32>
    %48 = vector.extract_strided_slice %44 {offsets = [0, 0, 24], sizes = [2, 8, 8], strides = [1, 1, 1]} : vector<2x8x32xf32> to vector<2x8x8xf32>
    %49 = vector.shape_cast %45 : vector<2x8x8xf32> to vector<2x1x8x8xf32>
    %50 = vector.shape_cast %46 : vector<2x8x8xf32> to vector<2x1x8x8xf32>
    %51 = vector.shape_cast %47 : vector<2x8x8xf32> to vector<2x1x8x8xf32>
    %52 = vector.shape_cast %48 : vector<2x8x8xf32> to vector<2x1x8x8xf32>
    %53 = tpu.concatenate %49, %50, %51, %52 in 1 : vector<2x1x8x8xf32>, vector<2x1x8x8xf32>, vector<2x1x8x8xf32>, vector<2x1x8x8xf32> -> vector<2x4x8x8xf32>
    %54 = vector.shape_cast %53 : vector<2x4x8x8xf32> to vector<8x8x8xf32>
    %55 = vector.shape_cast %40 : vector<16x32xf32> to vector<2x8x32xf32>
    %56 = vector.extract_strided_slice %55 {offsets = [0, 0, 0], sizes = [2, 8, 8], strides = [1, 1, 1]} : vector<2x8x32xf32> to vector<2x8x8xf32>
    %57 = vector.extract_strided_slice %55 {offsets = [0, 0, 8], sizes = [2, 8, 8], strides = [1, 1, 1]} : vector<2x8x32xf32> to vector<2x8x8xf32>
    %58 = vector.extract_strided_slice %55 {offsets = [0, 0, 16], sizes = [2, 8, 8], strides = [1, 1, 1]} : vector<2x8x32xf32> to vector<2x8x8xf32>
    %59 = vector.extract_strided_slice %55 {offsets = [0, 0, 24], sizes = [2, 8, 8], strides = [1, 1, 1]} : vector<2x8x32xf32> to vector<2x8x8xf32>
    %60 = vector.shape_cast %56 : vector<2x8x8xf32> to vector<2x1x8x8xf32>
    %61 = vector.shape_cast %57 : vector<2x8x8xf32> to vector<2x1x8x8xf32>
    %62 = vector.shape_cast %58 : vector<2x8x8xf32> to vector<2x1x8x8xf32>
    %63 = vector.shape_cast %59 : vector<2x8x8xf32> to vector<2x1x8x8xf32>
    %64 = tpu.concatenate %60, %61, %62, %63 in 1 : vector<2x1x8x8xf32>, vector<2x1x8x8xf32>, vector<2x1x8x8xf32>, vector<2x1x8x8xf32> -> vector<2x4x8x8xf32>
    %65 = vector.shape_cast %64 : vector<2x4x8x8xf32> to vector<8x8x8xf32>
    %66 = vector.shape_cast %43 : vector<16x32xf32> to vector<2x8x32xf32>
    %67 = vector.extract_strided_slice %66 {offsets = [0, 0, 0], sizes = [2, 8, 8], strides = [1, 1, 1]} : vector<2x8x32xf32> to vector<2x8x8xf32>
    %68 = vector.extract_strided_slice %66 {offsets = [0, 0, 8], sizes = [2, 8, 8], strides = [1, 1, 1]} : vector<2x8x32xf32> to vector<2x8x8xf32>
    %69 = vector.extract_strided_slice %66 {offsets = [0, 0, 16], sizes = [2, 8, 8], strides = [1, 1, 1]} : vector<2x8x32xf32> to vector<2x8x8xf32>
    %70 = vector.extract_strided_slice %66 {offsets = [0, 0, 24], sizes = [2, 8, 8], strides = [1, 1, 1]} : vector<2x8x32xf32> to vector<2x8x8xf32>
    %71 = vector.shape_cast %67 : vector<2x8x8xf32> to vector<2x1x8x8xf32>
    %72 = vector.shape_cast %68 : vector<2x8x8xf32> to vector<2x1x8x8xf32>
    %73 = vector.shape_cast %69 : vector<2x8x8xf32> to vector<2x1x8x8xf32>
    %74 = vector.shape_cast %70 : vector<2x8x8xf32> to vector<2x1x8x8xf32>
    %75 = tpu.concatenate %71, %72, %73, %74 in 1 : vector<2x1x8x8xf32>, vector<2x1x8x8xf32>, vector<2x1x8x8xf32>, vector<2x1x8x8xf32> -> vector<2x4x8x8xf32>
    %76 = vector.shape_cast %75 : vector<2x4x8x8xf32> to vector<8x8x8xf32>
    %c0_11 = arith.constant 0 : index
    %c0_12 = arith.constant 0 : index
    %c0_13 = arith.constant 0 : index
    %c0_14 = arith.constant 0 : index
    %77 = vector.load %arg1[%c0_11, %c0_12, %c0_13, %c0_14] : memref<2x4x8x8xf32, #tpu.memory_space<vmem>>, vector<2x4x8x8xf32>
    %78 = vector.shape_cast %77 : vector<2x4x8x8xf32> to vector<8x8x8xf32>
    "tpu.trace_start"() <{level = 10 : i32, message = "zpe,zqe->zpq"}> : () -> ()
    %cst_15 = arith.constant dense<0.000000e+00> : vector<8x8x8xf32>
    %79 = tpu.matmul %54, %65, %cst_15 {dimension_numbers = #tpu.dot_dimension_numbers<[2], [2], [1], [1], [0, 0, 0, 1, 1, 1], [0], [0]>} : vector<8x8x8xf32>, vector<8x8x8xf32>, vector<8x8x8xf32> -> vector<8x8x8xf32>
    "tpu.trace_stop"() : () -> ()
    %cst_16 = arith.constant 0.353553385 : f32
    %80 = vector.broadcast %cst_16 : f32 to vector<8x8x8xf32>
    %81 = arith.mulf %79, %80 : vector<8x8x8xf32>
    %82 = arith.addf %81, %78 : vector<8x8x8xf32>
    %83 = vector.shape_cast %82 : vector<8x8x8xf32> to vector<2x4x8x8xf32>
    %c0_17 = arith.constant 0 : index
    %c0_18 = arith.constant 0 : index
    %c0_19 = arith.constant 0 : index
    %c0_20 = arith.constant 0 : index
    %84 = vector.load %arg9[%c0_17, %c0_18, %c0_19, %c0_20] : memref<2x4x8x8xf32, #tpu.memory_space<vmem>>, vector<2x4x8x8xf32>
    tpu.vector_store %arg9[%c0_17, %c0_18, %c0_19, %c0_20], %83 {strides = array<i32>} : memref<2x4x8x8xf32, #tpu.memory_space<vmem>>, vector<2x4x8x8xf32>,
    %cst_21 = arith.constant dense<0xFF800000> : vector<8x8xf32>
    %85 = vector.multi_reduction <maximumf>, %82, %cst_21 [2] : vector<8x8x8xf32> to vector<8x8xf32>
    %cst_22 = arith.constant 0xFF800000 : f32
    %86 = vector.broadcast %cst_22 : f32 to vector<8x8xf32>
    %87 = arith.maximumf %86, %85 : vector<8x8xf32>
    %88 = vector.shape_cast %87 : vector<8x8xf32> to vector<8x8x1xf32>
    %89 = vector.broadcast %88 : vector<8x8x1xf32> to vector<8x8x8xf32>
    %90 = arith.subf %82, %89 : vector<8x8x8xf32>
    %91 = math.exp %90 : vector<8x8x8xf32>
    %cst_23 = arith.constant dense<0.000000e+00> : vector<8x8xf32>
    %92 = vector.multi_reduction <add>, %91, %cst_23 [2] : vector<8x8x8xf32> to vector<8x8xf32>
    %93 = vector.shape_cast %92 : vector<8x8xf32> to vector<8x8x1xf32>
    %94 = vector.broadcast %93 : vector<8x8x1xf32> to vector<8x8x8xf32>
    %95 = arith.divf %91, %94 : vector<8x8x8xf32>
    "tpu.trace_start"() <{level = 10 : i32, message = "zpq,zqe->zpe"}> : () -> ()
    %cst_24 = arith.constant dense<0.000000e+00> : vector<8x8x8xf32>
    %96 = tpu.matmul %95, %76, %cst_24 {dimension_numbers = #tpu.dot_dimension_numbers<[2], [1], [1], [2], [0, 0, 0, 1, 1, 2], [0], [0]>} : vector<8x8x8xf32>, vector<8x8x8xf32>, vector<8x8x8xf32> -> vector<8x8x8xf32>
    "tpu.trace_stop"() : () -> ()
    %97 = vector.shape_cast %96 : vector<8x8x8xf32> to vector<2x4x8x8xf32>
    %98 = vector.extract_strided_slice %97 {offsets = [0, 0, 0, 0], sizes = [2, 1, 8, 8], strides = [1, 1, 1, 1]} : vector<2x4x8x8xf32> to vector<2x1x8x8xf32>
    %99 = vector.shape_cast %98 : vector<2x1x8x8xf32> to vector<2x8x8xf32>
    %100 = vector.extract_strided_slice %97 {offsets = [0, 1, 0, 0], sizes = [2, 1, 8, 8], strides = [1, 1, 1, 1]} : vector<2x4x8x8xf32> to vector<2x1x8x8xf32>
    %101 = vector.shape_cast %100 : vector<2x1x8x8xf32> to vector<2x8x8xf32>
    %102 = vector.extract_strided_slice %97 {offsets = [0, 2, 0, 0], sizes = [2, 1, 8, 8], strides = [1, 1, 1, 1]} : vector<2x4x8x8xf32> to vector<2x1x8x8xf32>
    %103 = vector.shape_cast %102 : vector<2x1x8x8xf32> to vector<2x8x8xf32>
    %104 = vector.extract_strided_slice %97 {offsets = [0, 3, 0, 0], sizes = [2, 1, 8, 8], strides = [1, 1, 1, 1]} : vector<2x4x8x8xf32> to vector<2x1x8x8xf32>
    %105 = vector.shape_cast %104 : vector<2x1x8x8xf32> to vector<2x8x8xf32>
    %106 = tpu.concatenate %99, %101, %103, %105 in 2 : vector<2x8x8xf32>, vector<2x8x8xf32>, vector<2x8x8xf32>, vector<2x8x8xf32> -> vector<2x8x32xf32>
    %107 = vector.shape_cast %106 : vector<2x8x32xf32> to vector<16x32xf32>
    %c0_25 = arith.constant 0 : index
    %c0_26 = arith.constant 0 : index
    %108 = vector.load %arg3[%c0_25, %c0_26] : memref<32x32xf32, #tpu.memory_space<vmem>>, vector<32x32xf32>
    %cst_27 = arith.constant dense<0.000000e+00> : vector<16x32xf32>
    %109 = tpu.matmul %107, %108, %cst_27 {dimension_numbers = #tpu.dot_dimension_numbers<[1], [0], [0], [1], [0, 0, 1, 1], [], []>} : vector<16x32xf32>, vector<32x32xf32>, vector<16x32xf32> -> vector<16x32xf32>
    %110 = vector.broadcast %5 : vector<1x32xf32> to vector<16x32xf32>
    %111 = arith.addf %109, %110 : vector<16x32xf32>
    %112 = arith.addf %32, %111 : vector<16x32xf32>
    %cst_28 = arith.constant dense<0.000000e+00> : vector<32xf32>
    %113 = vector.multi_reduction <add>, %112, %cst_28 [0] : vector<16x32xf32> to vector<32xf32>
    %114 = vector.shape_cast %113 : vector<32xf32> to vector<1x32xf32>
    %cst_29 = arith.constant 6.250000e-02 : f32
    %115 = vector.broadcast %cst_29 : f32 to vector<1x32xf32>
    %116 = arith.mulf %114, %115 : vector<1x32xf32>
    %117 = arith.mulf %112, %112 : vector<16x32xf32>
    %cst_30 = arith.constant dense<0.000000e+00> : vector<32xf32>
    %118 = vector.multi_reduction <add>, %117, %cst_30 [0] : vector<16x32xf32> to vector<32xf32>
    %119 = vector.shape_cast %118 : vector<32xf32> to vector<1x32xf32>
    %cst_31 = arith.constant 6.250000e-02 : f32
    %120 = vector.broadcast %cst_31 : f32 to vector<1x32xf32>
    %121 = arith.mulf %119, %120 : vector<1x32xf32>
    %122 = arith.mulf %116, %116 : vector<1x32xf32>
    %123 = arith.subf %121, %122 : vector<1x32xf32>
    %cst_32 = arith.constant 9.99999974E-6 : f32
    %124 = vector.broadcast %cst_32 : f32 to vector<1x32xf32>
    %125 = arith.addf %123, %124 : vector<1x32xf32>
    %126 = math.rsqrt %125 : vector<1x32xf32>
    %127 = arith.mulf %126, %9 : vector<1x32xf32>
    %128 = vector.broadcast %127 : vector<1x32xf32> to vector<16x32xf32>
    %129 = arith.mulf %112, %128 : vector<16x32xf32>
    %130 = arith.mulf %116, %127 : vector<1x32xf32>
    %131 = arith.subf %10, %130 : vector<1x32xf32>
    %132 = vector.broadcast %131 : vector<1x32xf32> to vector<16x32xf32>
    %133 = arith.addf %129, %132 : vector<16x32xf32>
    %c0_33 = arith.constant 0 : index
    %c0_34 = arith.constant 0 : index
    %134 = vector.load %arg4[%c0_33, %c0_34] : memref<32x64xf32, #tpu.memory_space<vmem>>, vector<32x64xf32>
    %cst_35 = arith.constant dense<0.000000e+00> : vector<16x64xf32>
    %135 = tpu.matmul %133, %134, %cst_35 {dimension_numbers = #tpu.dot_dimension_numbers<[1], [0], [0], [1], [0, 0, 1, 1], [], []>} : vector<16x32xf32>, vector<32x64xf32>, vector<16x64xf32> -> vector<16x64xf32>
    %c0_36 = arith.constant 0 : index
    %c0_37 = arith.constant 0 : index
    %136 = vector.load %arg7[%c0_36, %c0_37] : memref<1x64xf32, #tpu.memory_space<vmem>>, vector<1x64xf32>
    %137 = vector.broadcast %136 : vector<1x64xf32> to vector<16x64xf32>
    %138 = arith.addf %135, %137 : vector<16x64xf32>
    %cst_38 = arith.constant 5.000000e-01 : f32
    %139 = vector.broadcast %cst_38 : f32 to vector<16x64xf32>
    %140 = arith.mulf %139, %138 : vector<16x64xf32>
    %cst_39 = arith.constant 0.707106769 : f32
    %141 = vector.broadcast %cst_39 : f32 to vector<16x64xf32>
    %142 = arith.mulf %138, %141 : vector<16x64xf32>
    %143 = math.erf %142 : vector<16x64xf32>
    %cst_40 = arith.constant 1.000000e+00 : f32
    %144 = vector.broadcast %cst_40 : f32 to vector<16x64xf32>
    %145 = arith.addf %144, %143 : vector<16x64xf32>
    %146 = arith.mulf %140, %145 : vector<16x64xf32>
    %c0_41 = arith.constant 0 : index
    %c0_42 = arith.constant 0 : index
    %147 = vector.load %arg5[%c0_41, %c0_42] : memref<64x32xf32, #tpu.memory_space<vmem>>, vector<64x32xf32>
    %cst_43 = arith.constant dense<0.000000e+00> : vector<16x32xf32>
    %148 = tpu.matmul %146, %147, %cst_43 {dimension_numbers = #tpu.dot_dimension_numbers<[1], [0], [0], [1], [0, 0, 1, 1], [], []>} : vector<16x64xf32>, vector<64x32xf32>, vector<16x32xf32> -> vector<16x32xf32>
    %149 = vector.broadcast %6 : vector<1x32xf32> to vector<16x32xf32>
    %150 = arith.addf %148, %149 : vector<16x32xf32>
    %151 = arith.addf %133, %150 : vector<16x32xf32>
    %152 = vector.shape_cast %151 : vector<16x32xf32> to vector<2x8x32xf32>
    %c0_44 = arith.constant 0 : index
    %c0_45 = arith.constant 0 : index
    %c0_46 = arith.constant 0 : index
    %153 = vector.load %arg8[%c0_44, %c0_45, %c0_46] : memref<2x8x32xf32, #tpu.memory_space<vmem>>, vector<2x8x32xf32>
    tpu.vector_store %arg8[%c0_44, %c0_45, %c0_46], %152 {strides = array<i32>} : memref<2x8x32xf32, #tpu.memory_space<vmem>>, vector<2x8x32xf32>,
    return
  }
}

</mosaic_0001>

<bundles_post_ra>
// kernel: tpu_custom_call.1
= control target key start
LH: loop header
LB: loop body
LE: loop exit
PB: predicated region body
PF: predicated region fallthrough
CT: control target
= control target key end

     0   :  { %15 = vsyncpa [#allocation3], 0  ;;  %s1919_s0 = inlined_call_operand.hbm [shape: f32[2,8,32], index: 0, kind: input, shape index: {}]   ;;  %s1920_s1 = inlined_call_operand.vmem [shape: f32[2,4,8,8], index: 1, kind: input, shape index: {}]   ;;  %s1921_s2 = inlined_call_operand.vmem [shape: f32[32,96], index: 2, kind: input, shape index: {}]   ;;  %s1922_s3 = inlined_call_operand.hbm [shape: f32[32,32], index: 3, kind: input, shape index: {}]   ;;  %s1923_s4 = inlined_call_operand.hbm [shape: f32[32,64], index: 4, kind: input, shape index: {}]   ;;  %s1924_s5 = inlined_call_operand.vmem [shape: f32[64,32], index: 5, kind: input, shape index: {}]   ;;  %s1925_s6 = inlined_call_operand.hbm [shape: f32[9,32], index: 6, kind: input, shape index: {}]   ;;  %s1926_s7 = inlined_call_operand.vmem [shape: f32[1,64], index: 7, kind: input, shape index: {}]   ;;  %s1927_s8 = inlined_call_operand.hbm [shape: f32[2,8,32], index: 8, kind: output, shape index: {0}]   ;;  %s1928_s9 = inlined_call_operand.hbm [shape: f32[2,4,8,8], index: 9, kind: output, shape index: {1}]  }
   0x1   :  { %16 = vsyncpa [#allocation6], 0 }
   0x2   :  { %17 = vsyncpa [#allocation9], 0 }
   0x3   :  { %18 = vsyncpa [#allocation4], 0 }
   0x4   :  { %19 = vsyncpa [#allocation12], 0  ;;  %s41_s11 = sshll.u32 %s1922_s3, 4  ;;  %s1479_s12 = smov [#allocation5]   ;;  %s42_s11 = int_to_ptr.hbm [resolvable:$true] %s41_s11 }
   0x5   :  { %s43_s13 = sshll.u32 %s1479_s12, 4  ;;  %s24_s16 = sshll.u32 %s1919_s0, 4  ;;  %s44_s13 = int_to_ptr.vmem [resolvable:$true] %s43_s13  ;;  %s25_s16 = int_to_ptr.hbm [resolvable:$true] %s24_s16 }
   0x6   :  { %s1480_s17 = smov 128   ;;  %s1481_s18 = smov 8  }
   0x7   :  { %49 = dma.hbm_to_vmem [thread:$0]  %s42_s11, 512, %s44_s13, [#allocation6], %s1480_s17, %s1480_s17, %s1481_s18  }
   0x8   :  { %s1482_s19 = smov [#allocation2]   ;;  %s54_s3 = sshll.u32 %s1923_s4, 4  ;;  %s55_s3 = int_to_ptr.hbm [resolvable:$true] %s54_s3 }
   0x9   :  { %s26_s20 = sshll.u32 %s1482_s19, 4  ;;  %s69_s24 = sshll.u32 %s1925_s6, 4  ;;  %s27_s20 = int_to_ptr.vmem [resolvable:$true] %s26_s20  ;;  %s70_s24 = int_to_ptr.hbm [resolvable:$true] %s69_s24 }
   0xa   :  { %32 = dma.hbm_to_vmem [thread:$0]  %s25_s16, 256, %s27_s20, [#allocation3], %s1480_s17, %s1480_s17, %s1481_s18  }
   0xb   :  { %s1483_s25 = smov [#allocation7]   ;;  %s1484_s27 = smov [#allocation8]  }
   0xc   :  { %s56_s26 = sshll.u32 %s1483_s25, 4  ;;  %s71_s4 = sshll.u32 %s1484_s27, 4  ;;  %s57_s26 = int_to_ptr.vmem [resolvable:$true] %s56_s26  ;;  %s72_s4 = int_to_ptr.vmem [resolvable:$true] %s71_s4 }
   0xd   :  { %62 = dma.hbm_to_vmem [thread:$0]  %s55_s3, 512, %s57_s26, [#allocation6], %s1480_s17, %s1480_s17, %s1481_s18  }
   0xe   :  { %77 = dma.hbm_to_vmem [thread:$0]  %s70_s24, 256, %s72_s4, [#allocation9], %s1480_s17, %s1480_s17, %s1481_s18  }
   0xf   :  { %1469 = dma.done.wait [#allocation3], 256  }
  0x10   :  { %1470 = vsyncadd [#allocation3], 4294967040 }
  0x11   :  { %1471 = dma.done.wait [#allocation6], 1024  }
  0x12   :  { %1472 = vsyncadd [#allocation6], 4294966272 }
  0x13   :  { %1473 = dma.done.wait [#allocation9], 256  }
  0x14   :  { %1474 = vsyncadd [#allocation9], 4294967040  ;;  %vm100_vm0 = vcmask 261120   ;;  %v151_v0 = vld [vmem:[%s1921_s2 + $0x18] sm:$0xff]  ;;  %v150_v1 = vld [vmem:[%s1921_s2 + $0x10] sm:$0xff]  ;;  %s1486_s14 = smov 112  }
  0x15   :  { %170 = vmatpush.msra.mxu0 %v151_v0  ;;  %v96_v2 = vld [vmem:[#allocation2] sm:$0xff]  ;;  %v97_v3 = vld [vmem:[#allocation2 + $0x8] sm:$0xff]  ;;  %v1585_v31 = vld [vmem:[#allocation8] sm:$0xff]  ;;  %s1487_s15 = smov 120   ;;  %s1488_s16 = smov 104   ;;  %vm250_vm4 = vcmask 64512  }
  0x16   :  { %v149_v4 = vld [vmem:[%s1921_s2 + $0x8] sm:$0xff]  ;;  %v101_v5 = vsel %vm100_vm0, %v96_v2, 0.0  ;;  %v102_v6 = vsel %vm100_vm0, %v97_v3, 0.0  ;;  %v111_v7 = vmul.f32 %v96_v2, %v96_v2  ;;  %v112_v8 = vmul.f32 %v97_v3, %v97_v3  ;;  %v148_v10 = vld [vmem:[%s1921_s2] sm:$0xff]  ;;  %s1485_s2 = smov 32   ;;  %s1489_s19 = smov 96  }
  0x17   :  { %171 = vmatpush.msra.mxu0 %v150_v1  ;;  %v103_v9 = vadd.f32 %v102_v6, %v101_v5  ;;  %v184_v33 = vperm.slane %v1585_v31, 1  ;;  %v181_v55 = vperm.slane %v1585_v31, 0  ;;  %v191_v1 = vperm.slane %v1585_v31, 2  ;;  %s1490_s20 = smov 64   ;;  %s1492_s12 = smov 24  }
  0x18   :  { %v113_v11 = vsel %vm100_vm0, %v111_v7, 0.0  ;;  %v114_v12 = vsel %vm100_vm0, %v112_v8, 0.0  ;;  %s1183_s30 = sshll.u32 %s1928_s9, 4  ;;  %s1494_s10 = smov [#allocation10]   ;;  %s1184_s30 = int_to_ptr.hbm [resolvable:$true] %s1183_s30 }
  0x19   :  { %172 = vmatpush.msra.mxu0 %v149_v4  ;;  %v104_v13 = vrot.slane %v103_v9, 4  ;;  %v115_v14 = vadd.f32 %v114_v12, %v113_v11  ;;  %186 = vrot.lane.b32.xlu0 %v184_v33, %s1485_s2  ;;  %s1168_s11 = sshll.u32 %s1494_s10, 4  ;;  %s1170_s9 = sshll.u32 %s1927_s8, 4  ;;  %s1169_s11 = int_to_ptr.vmem [resolvable:$true] %s1168_s11  ;;  %s1171_s9 = int_to_ptr.hbm [resolvable:$true] %s1170_s9 }
  0x1b   :  { %173 = vmatpush.msra.mxu0 %v148_v10  ;;  %v105_v15 = vadd.f32 %v104_v13, %v103_v9  ;;  %v116_v16 = vrot.slane %v115_v14, 4 }
  0x1d   :  { %v106_v17 = vrot.slane %v105_v15, 2  ;;  %v117_v18 = vadd.f32 %v116_v16, %v115_v14 }
  0x1f   :  { %v107_v19 = vadd.f32 %v106_v17, %v105_v15  ;;  %v118_v20 = vrot.slane %v117_v18, 2 }
  0x21   :  { %v108_v21 = vrot.slane %v107_v19, 1  ;;  %v119_v22 = vadd.f32 %v118_v20, %v117_v18 }
  0x23   :  { %v109_v23 = vadd.f32 %v108_v21, %v107_v19  ;;  %v120_v24 = vrot.slane %v119_v22, 1  ;;  %v240_v19 = vld [vmem:[%s1920_s1] sm:$0xff] }
  0x25   :  { %v110_v25 = vmul.f32 0.0625, %v109_v23  ;;  %v121_v26 = vadd.f32 %v120_v24, %v119_v22  ;;  %v241_v23 = vld [vmem:[%s1920_s1 + $0x8] sm:$0xff] }
  0x27   :  { %v122_v27 = vmul.f32 0.0625, %v121_v26  ;;  %v123_v28 = vmul.f32 %v110_v25, %v110_v25 }
  0x29   :  { %v124_v29 = vsub.f32 %v122_v27, %v123_v28  ;;  %v242_v28 = vld [vmem:[%s1920_s1 + $0x10] sm:$0xff] }
  0x2b   :  { %v125_v30 = vadd.f32 1e-05, %v124_v29 }
  0x2d   :  { %1284 = vrsqrt.f32 %v125_v30  ;;  %vm132_vm1 = vweird.f32 %v125_v30 }
  0x33   :  { %v1285_v32 = vpop.eup %1284 }
  0x34   :  { %v127_v34 = vmul.f32 %v1285_v32, %v125_v30  ;;  %vm133_vm2 = vweird.f32 %v1285_v32  ;;  %v244_v30 = vld [vmem:[%s1920_s1 + $0x20] sm:$0xff] }
  0x35   :  { %vm134_vm3 = vmor %vm132_vm1, %vm133_vm2 }
  0x36   :  { %v128_v35 = vmul.f32 %v1285_v32, %v127_v34 }
  0x38   :  { %v129_v36 = vmul.f32 0.5, %v128_v35 }
  0x3a   :  { %v130_v37 = vsub.f32 1.5, %v129_v36 }
  0x3c   :  { %v131_v38 = vmul.f32 %v1285_v32, %v130_v37 }
  0x3e   :  { %v135_v39 = vsel %vm134_vm3, %v1285_v32, %v131_v38  ;;  %v247_v38 = vld [vmem:[%s1920_s1 + $0x38] sm:$0xff] }
  0x3f   :  { %v136_v40 = vmul.f32 %v135_v39, %v1585_v31 }
  0x41   :  { %v137_v41 = vperm.slane %v136_v40, 5  ;;  %v140_v42 = vmul.f32 %v136_v40, %v110_v25 }
  0x43   :  { %v142_v43 = vrot.slane %v140_v42, 7  ;;  %v138_v44 = vmul.f32 %v137_v41, %v96_v2  ;;  %v139_v48 = vmul.f32 %v137_v41, %v97_v3 }
  0x45   :  { %v144_v45 = vsub.f32 %v1585_v31, %v142_v43  ;;  %v243_v43 = vld [vmem:[%s1920_s1 + $0x18] sm:$0xff] }
  0x47   :  { %v145_v46 = vperm.slane %v144_v45, 6 }
  0x49   :  { %v1590_v47 = vadd.f32 %v145_v46, %v138_v44  ;;  %v1594_v49 = vadd.f32 %v145_v46, %v139_v48 }
  0x4b   :  { %1203 = vmatmul.msk.f32.vlgmr.msra.gmra.mxu0 %vm100_vm0, %v1590_v47 }
  0x53   :  { %1204 = vmatmul.msk.f32.gmra.mxu0 %vm100_vm0, %v1594_v49 }
  0x8b   :  { %v187_v50 = vpop.permute.xlu0 %186 }
  0xc8   :  { %v1598_v51 = vpop.f32.mrf.mxu0 }
  0xc9   :  { %v189_v52 = vadd.f32 %v187_v50, %v1598_v51  ;;  %v182_v56 = vadd.f32 %v181_v55, %v1598_v51 }
  0xcb   :  { %218 = vrot.lane.b32.xlu1 %v189_v52, %s1486_s14  ;;  %214 = vrot.lane.b32.xlu0 %v189_v52, %s1487_s15 }
  0xd0   :  { %v1603_v53 = vpop.f32.mrf.mxu0 }
  0xd1   :  { %v190_v54 = vadd.f32 %v187_v50, %v1603_v53  ;;  %v183_v57 = vadd.f32 %v181_v55, %v1603_v53  ;;  %v246_v50 = vld [vmem:[%s1920_s1 + $0x30] sm:$0xff]  ;;  %v245_v55 = vld [vmem:[%s1920_s1 + $0x28] sm:$0xff]  ;;  %s1491_s1 = smov 16  }
  0xd3   :  { %222 = vrot.lane.b32.xlu1 %v189_v52, %s1488_s16  ;;  %220 = vrot.lane.b32.xlu0 %v190_v54, %s1486_s14 }
  0xd4   :  { %224 = vrot.lane.b32.xlu2 %v190_v54, %s1488_s16 }
  0xdb   :  { %248 = vrot.lane.b32.xlu1 %v189_v52, %s1489_s19  ;;  %200 = vrot.lane.b32.xlu0 %v182_v56, %s1487_s15 }
  0xdc   :  { %216 = vrot.lane.b32.xlu2 %v190_v54, %s1487_s15 }
  0xe3   :  { %353 = vrot.lane.b32.xlu1 %v190_v54, %s1489_s19 }
  0xeb   :  { %204 = vrot.lane.b32.xlu1 %v182_v56, %s1486_s14 }
  0xf3   :  { %210 = vrot.lane.b32.xlu1 %v183_v57, %s1488_s16 }
 0x12e   :  { %v225_v62 = vpop.permute.xlu2 %224 }
 0x136   :  { %v217_v0 = vpop.permute.xlu2 %216 }
 0x13d   :  { %v219_v58 = vpop.permute.xlu1 %218  ;;  %v215_v59 = vpop.permute.xlu0 %214 }
 0x13e   :  { %275 = vrot.lane.b32.xlu2 %v215_v59, %s1489_s19 }
 0x145   :  { %v223_v60 = vpop.permute.xlu1 %222  ;;  %v221_v61 = vpop.permute.xlu0 %220 }
 0x146   :  { %327 = vrot.lane.b32.xlu0 %v223_v60, %s1489_s19  ;;  %301 = vrot.lane.b32.xlu2 %v219_v58, %s1489_s19 }
 0x147   :  { %405 = vrot.lane.b32.xlu1 %v221_v61, %s1489_s19 }
 0x14d   :  { %v249_v63 = vpop.permute.xlu1 %248  ;;  %v201_v4 = vpop.permute.xlu0 %200 }
 0x14e   :  { %1205 = vmatpush.xpose.msk.msra.mxu2 %vm250_vm4, %v249_v63  ;;  %208 = vrot.lane.b32.xlu0 %v182_v56, %s1488_s16 }
 0x14f   :  { %431 = vrot.lane.b32.xlu2 %v225_v62, %s1489_s19 }
 0x151   :  { %1206 = vmatmul.msk.f32.vlgmr.msra.gmra.mxu2 %vm250_vm4, %v182_v56 }
 0x155   :  { %v354_v2 = vpop.permute.xlu1 %353 }
 0x156   :  { %202 = vrot.lane.b32.xlu0 %v183_v57, %s1487_s15 }
 0x157   :  { %379 = vrot.lane.b32.xlu2 %v217_v0, %s1489_s19 }
 0x15d   :  { %v205_v6 = vpop.permute.xlu1 %204 }
 0x15e   :  { %193 = vrot.lane.b32.xlu0 %v191_v1, %s1490_s20 }
 0x15f   :  { %206 = vrot.lane.b32.xlu2 %v183_v57, %s1486_s14 }
 0x165   :  { %v211_v8 = vpop.permute.xlu1 %210 }
 0x198   :  { %v276_v3 = vpop.permute.xlu2 %275 }
 0x199   :  { %1207 = vmatpush.xpose.msk.msrb.mxu2 %vm250_vm4, %v276_v3 }
 0x19c   :  { %1208 = vmatmul.msk.f32.vlgmr.msrb.gmra.mxu2 %vm250_vm4, %v201_v4 }
 0x19d   :  { %1213 = vmatpush.xpose.msk.msra.mxu2 %vm250_vm4, %v354_v2 }
 0x1a0   :  { %v302_v5 = vpop.permute.xlu2 %301 }
 0x1a1   :  { %1209 = vmatpush.xpose.msk.msra.mxu3 %vm250_vm4, %v302_v5 }
 0x1a4   :  { %1210 = vmatmul.msk.f32.vlgmr.msra.gmra.mxu3 %vm250_vm4, %v205_v6  ;;  %1214 = vmatmul.msk.f32.vlgmr.msra.gmra.mxu2 %vm250_vm4, %v183_v57 }
 0x1a9   :  { %v432_v7 = vpop.permute.xlu2 %431 }
 0x1aa   :  { %1219 = vmatpush.xpose.msk.msrb.mxu2 %vm250_vm4, %v432_v7 }
 0x1ad   :  { %1220 = vmatmul.msk.f32.vlgmr.msrb.gmra.mxu2 %vm250_vm4, %v211_v8 }
 0x1b1   :  { %v380_v9 = vpop.permute.xlu2 %379 }
 0x1b2   :  { %1215 = vmatpush.xpose.msk.msrb.mxu3 %vm250_vm4, %v380_v9 }
 0x1b8   :  { %v328_v10 = vpop.permute.xlu0 %327 }
 0x1b9   :  { %v406_v11 = vpop.permute.xlu1 %405  ;;  %1211 = vmatpush.xpose.msk.msra.mxu1 %vm250_vm4, %v328_v10  ;;  %v207_v13 = vpop.permute.xlu2 %206 }
 0x1bd   :  { %1217 = vmatpush.xpose.msk.msrb.mxu1 %vm250_vm4, %v406_v11 }
 0x1c0   :  { %v209_v12 = vpop.permute.xlu0 %208 }
 0x1c1   :  { %1212 = vmatmul.msk.f32.vlgmr.msra.gmra.mxu1 %vm250_vm4, %v209_v12 }
 0x1c8   :  { %v203_v14 = vpop.permute.xlu0 %202 }
 0x1c9   :  { %1216 = vmatmul.msk.f32.vlgmr.msrb.gmra.mxu3 %vm250_vm4, %v203_v14  ;;  %1218 = vmatmul.msk.f32.vlgmr.msrb.gmra.mxu1 %vm250_vm4, %v207_v13 }
 0x1d0   :  { %v194_v15 = vpop.permute.xlu0 %193 }
 0x1d1   :  { %v1638_v16 = vadd.f32 %v194_v15, %v1598_v51  ;;  %v1641_v17 = vadd.f32 %v194_v15, %v1603_v53 }
 0x1d3   :  { %v1253_v18 = vpack.i.bf16 %v1641_v17, %v1638_v16 }
 0x1d4   :  { %v272_v20 = vpop.f32.mrf.mxu2 }
 0x1d5   :  { %v457_v21 = vmul.f32 0.35355338, %v272_v20  ;;  %1254 = vrot.lane.b32.xlu0 %v1253_v18, %s1488_s16 }
 0x1d7   :  { %v1649_v22 = vadd.f32 %v457_v21, %v240_v19 }
 0x1d9   :  { %473 = vst.msk [vmem:[#allocation11] sm:$0xff] %vm250_vm4, %v1649_v22  ;;  %v481_v42 = vsel %vm250_vm4, %v1649_v22, -inf }
 0x21f   :  { %v298_v24 = vpop.f32.mrf.mxu2 }
 0x220   :  { %v458_v25 = vmul.f32 0.35355338, %v298_v24 }
 0x222   :  { %v466_v26 = vadd.f32 %v458_v25, %v241_v23 }
 0x224   :  { %474 = vst.msk [vmem:[#allocation11 + $0x8] sm:$0xff] %vm250_vm4, %v466_v26  ;;  %v484_v27 = vsel %vm250_vm4, %v466_v26, -inf }
 0x225   :  { %485 = vmax.xlane.f32.xlu2 %v484_v27 }
 0x227   :  { %v324_v29 = vpop.f32.mrf.mxu3  ;;  %v376_v32 = vpop.f32.mrf.mxu2 }
 0x228   :  { %v459_v33 = vmul.f32 0.35355338, %v324_v29  ;;  %v461_v34 = vmul.f32 0.35355338, %v376_v32 }
 0x22a   :  { %v467_v35 = vadd.f32 %v459_v33, %v242_v28  ;;  %v1664_v36 = vadd.f32 %v461_v34, %v244_v30 }
 0x22c   :  { %475 = vst.msk [vmem:[#allocation11 + $0x10] sm:$0xff] %vm250_vm4, %v467_v35  ;;  %v487_v37 = vsel %vm250_vm4, %v467_v35, -inf  ;;  %v493_v61 = vsel %vm250_vm4, %v1664_v36, -inf }
 0x22d   :  { %477 = vst.msk [vmem:[#allocation11 + $0x20] sm:$0xff] %vm250_vm4, %v1664_v36  ;;  %488 = vmax.xlane.f32.xlu0 %v487_v37 }
 0x230   :  { %v454_v39 = vpop.f32.mrf.mxu2 }
 0x231   :  { %v464_v40 = vmul.f32 0.35355338, %v454_v39 }
 0x233   :  { %v1673_v41 = vadd.f32 %v464_v40, %v247_v38 }
 0x235   :  { %480 = vst.msk [vmem:[#allocation11 + $0x38] sm:$0xff] %vm250_vm4, %v1673_v41  ;;  %482 = vmax.xlane.f32.xlu0 %v481_v42  ;;  %v502_v60 = vsel %vm250_vm4, %v1673_v41, -inf }
 0x23e   :  { %v350_v44 = vpop.f32.mrf.mxu1 }
 0x23f   :  { %v460_v45 = vmul.f32 0.35355338, %v350_v44 }
 0x241   :  { %v468_v46 = vadd.f32 %v460_v45, %v243_v43 }
 0x243   :  { %476 = vst.msk [vmem:[#allocation11 + $0x18] sm:$0xff] %vm250_vm4, %v468_v46  ;;  %v490_v48 = vsel %vm250_vm4, %v468_v46, -inf }
 0x244   :  { %491 = vmax.xlane.f32.xlu1 %v490_v48 }
 0x246   :  { %v428_v51 = vpop.f32.mrf.mxu1 }
 0x247   :  { %v463_v52 = vmul.f32 0.35355338, %v428_v51  ;;  %v1255_v62 = vpop.permute.xlu0 %1254 }
 0x248   :  { %v1256_v40 = vunpack.i.l.bf16 %v1255_v62  ;;  %v1257_v42 = vunpack.i.h.bf16 %v1255_v62 }
 0x249   :  { %v471_v53 = vadd.f32 %v463_v52, %v246_v50 }
 0x24b   :  { %479 = vst.msk [vmem:[#allocation11 + $0x30] sm:$0xff] %vm250_vm4, %v471_v53  ;;  %v499_v54 = vsel %vm250_vm4, %v471_v53, -inf }
 0x24c   :  { %v402_v56 = vpop.f32.mrf.mxu3  ;;  %500 = vmax.xlane.f32.xlu2 %v499_v54 }
 0x24d   :  { %v462_v57 = vmul.f32 0.35355338, %v402_v56 }
 0x24f   :  { %v470_v58 = vadd.f32 %v462_v57, %v245_v55 }
 0x251   :  { %478 = vst.msk [vmem:[#allocation11 + $0x28] sm:$0xff] %vm250_vm4, %v470_v58  ;;  %v496_v59 = vsel %vm250_vm4, %v470_v58, -inf }
 0x252   :  { %497 = vmax.xlane.f32.xlu1 %v496_v59 }
 0x254   :  { %503 = vmax.xlane.f32.xlu2 %v502_v60 }
 0x26b   :  { %1259 = vrot.lane.b32.xlu1 %v1253_v18, %s1487_s15 }
 0x26c   :  { %1264 = vrot.lane.b32.xlu2 %v1253_v18, %s1486_s14 }
 0x295   :  { %494 = vmax.xlane.f32.xlu1 %v493_v61 }
 0x298   :  { %v486_v63 = vpop.xlane.xlu2 %485 }
 0x299   :  { %v506_v0 = vsub.f32 %v466_v26, %v486_v63 }
 0x29b   :  { %v515_v1 = vmul.f32 1.442695, %v506_v0 }
 0x29d   :  { %1286 = vpow2.f32 %v515_v1 }
 0x2a0   :  { %v489_v2 = vpop.xlane.xlu0 %488 }
 0x2a1   :  { %v507_v3 = vsub.f32 %v467_v35, %v489_v2 }
 0x2a3   :  { %v1700_v4 = vpop.eup %1286  ;;  %v517_v5 = vmul.f32 1.442695, %v507_v3 }
 0x2a4   :  { %v532_v6 = vsel %vm250_vm4, %v1700_v4, 0.0 }
 0x2a5   :  { %1288 = vpow2.f32 %v517_v5  ;;  %533 = vadd.xlane.f32.xlu0 %v532_v6 }
 0x2a8   :  { %v483_v45 = vpop.xlane.xlu0 %482 }
 0x2ab   :  { %v1704_v7 = vpop.eup %1288 }
 0x2ac   :  { %v535_v8 = vsel %vm250_vm4, %v1704_v7, 0.0 }
 0x2ad   :  { %536 = vadd.xlane.f32.xlu1 %v535_v8 }
 0x2b7   :  { %v492_v9 = vpop.xlane.xlu1 %491 }
 0x2b8   :  { %v508_v10 = vsub.f32 %v468_v46, %v492_v9  ;;  %v505_v46 = vsub.f32 %v1649_v22, %v483_v45 }
 0x2ba   :  { %v519_v11 = vmul.f32 1.442695, %v508_v10  ;;  %v513_v48 = vmul.f32 1.442695, %v505_v46 }
 0x2bc   :  { %1290 = vpow2.f32 %v519_v11 }
 0x2bf   :  { %v501_v12 = vpop.xlane.xlu2 %500 }
 0x2c0   :  { %v511_v13 = vsub.f32 %v471_v53, %v501_v12 }
 0x2c2   :  { %v1708_v14 = vpop.eup %1290  ;;  %v525_v15 = vmul.f32 1.442695, %v511_v13 }
 0x2c3   :  { %v538_v18 = vsel %vm250_vm4, %v1708_v14, 0.0 }
 0x2c4   :  { %1292 = vpow2.f32 %v525_v15  ;;  %539 = vadd.xlane.f32.xlu2 %v538_v18 }
 0x2c5   :  { %v498_v19 = vpop.xlane.xlu1 %497 }
 0x2c6   :  { %v510_v20 = vsub.f32 %v470_v58, %v498_v19 }
 0x2c7   :  { %v504_v21 = vpop.xlane.xlu2 %503 }
 0x2c8   :  { %v523_v23 = vmul.f32 1.442695, %v510_v20  ;;  %v512_v24 = vsub.f32 %v1673_v41, %v504_v21 }
 0x2ca   :  { %v1713_v25 = vpop.eup %1292  ;;  %1294 = vpow2.f32 %v523_v23  ;;  %v527_v26 = vmul.f32 1.442695, %v512_v24 }
 0x2cb   :  { %v547_v27 = vsel %vm250_vm4, %v1713_v25, 0.0 }
 0x2cc   :  { %1296 = vpow2.f32 %v527_v26  ;;  %548 = vadd.xlane.f32.xlu1 %v547_v27 }
 0x2cd   :  { %1298 = vpow2.f32 %v513_v48 }
 0x2cf   :  { %v1265_v34 = vpop.permute.xlu2 %1264 }
 0x2d0   :  { %v1717_v28 = vpop.eup %1294  ;;  %v1267_v37 = vunpack.i.h.bf16 %v1265_v34  ;;  %v1266_v41 = vunpack.i.l.bf16 %v1265_v34 }
 0x2d1   :  { %v544_v29 = vsel %vm250_vm4, %v1717_v28, 0.0 }
 0x2d2   :  { %v1721_v30 = vpop.eup %1296  ;;  %545 = vadd.xlane.f32.xlu2 %v544_v29  ;;  %v1273_v44 = vpack.i.bf16 %v1257_v42, %v1266_v41 }
 0x2d3   :  { %v550_v32 = vsel %vm250_vm4, %v1721_v30, 0.0  ;;  %v1734_v53 = vpop.eup %1298 }
 0x2d4   :  { %551 = vadd.xlane.f32.xlu0 %v550_v32  ;;  %v529_v54 = vsel %vm250_vm4, %v1734_v53, 0.0 }
 0x2dd   :  { %v1260_v33 = vpop.permute.xlu1 %1259 }
 0x2de   :  { %v1262_v35 = vunpack.i.h.bf16 %v1260_v33  ;;  %v1261_v38 = vunpack.i.l.bf16 %v1260_v33 }
 0x2e0   :  { %v1278_v39 = vpack.i.bf16 %v1267_v37, %v1262_v35  ;;  %v1268_v43 = vpack.i.bf16 %v1261_v38, %v1256_v40 }
 0x2e5   :  { %1279 = vrot.lane.b32.xlu1 %v1278_v39, %s1490_s20 }
 0x2e8   :  { %1269 = vrot.lane.b32.xlu0 %v1268_v43, %s1490_s20 }
 0x2ea   :  { %1274 = vrot.lane.b32.xlu2 %v1273_v44, %s1490_s20 }
 0x2ed   :  { %673 = vrot.lane.b32.xlu1 %v1638_v16, %s1490_s20 }
 0x2f5   :  { %777 = vrot.lane.b32.xlu1 %v1641_v17, %s1490_s20 }
 0x308   :  { %v495_v50 = vpop.xlane.xlu1 %494 }
 0x309   :  { %v509_v51 = vsub.f32 %v1664_v36, %v495_v50 }
 0x30b   :  { %v521_v52 = vmul.f32 1.442695, %v509_v51 }
 0x30d   :  { %1300 = vpow2.f32 %v521_v52 }
 0x312   :  { %530 = vadd.xlane.f32.xlu0 %v529_v54 }
 0x313   :  { %v1738_v16 = vpop.eup %1300 }
 0x314   :  { %v541_v17 = vsel %vm250_vm4, %v1738_v16, 0.0 }
 0x315   :  { %542 = vadd.xlane.f32.xlu2 %v541_v17 }
 0x318   :  { %v1742_v55 = vpop.xlane.xlu0 %533 }
 0x319   :  { %vm573_vm9 = vweird.f32 %v1742_v55  ;;  %v579_v27 = vand.u32 2147483648, %v1742_v55  ;;  %v577_v39 = vand.u32 2147483647, %v1742_v55 }
 0x31b   :  { %v580_v45 = vor.u32 1.1754944e-38, %v579_v27  ;;  %vm578_vm1 = vcmp.eq.f32.partialorder %v577_v39, 8.507059e+37 }
 0x320   :  { %v537_v22 = vpop.xlane.xlu1 %536 }
 0x321   :  { %1302 = vrcp.f32 %v537_v22  ;;  %v594_v5 = vand.u32 2147483648, %v537_v22  ;;  %vm588_vm6 = vweird.f32 %v537_v22  ;;  %v592_v8 = vand.u32 2147483647, %v537_v22 }
 0x322   :  { %1304 = vrcp.f32 %v1742_v55 }
 0x323   :  { %v595_v15 = vor.u32 1.1754944e-38, %v594_v5  ;;  %vm593_vm8 = vcmp.eq.f32.partialorder %v592_v8, 8.507059e+37 }
 0x327   :  { %v1303_v56 = vpop.eup %1302 }
 0x328   :  { %v584_v36 = vmul.f32 %v1303_v56, %v537_v22  ;;  %v1748_v59 = vpop.eup %1304  ;;  %vm589_vm5 = vweird.f32 %v1303_v56 }
 0x329   :  { %v569_v61 = vmul.f32 %v1748_v59, %v1742_v55  ;;  %vm590_vm7 = vmor %vm588_vm6, %vm589_vm5  ;;  %vm574_vm10 = vweird.f32 %v1748_v59 }
 0x32a   :  { %v585_v58 = vsub.f32 1.0, %v584_v36  ;;  %vm1780_vm12 = vmor %vm573_vm9, %vm574_vm10 }
 0x32b   :  { %v570_v0 = vsub.f32 1.0, %v569_v61 }
 0x32c   :  { %v586_v62 = vmul.f32 %v1303_v56, %v585_v58 }
 0x32d   :  { %v571_v11 = vmul.f32 %v1748_v59, %v570_v0 }
 0x32e   :  { %v587_v1 = vadd.f32 %v1303_v56, %v586_v62 }
 0x32f   :  { %v572_v23 = vadd.f32 %v1748_v59, %v571_v11 }
 0x330   :  { %v591_v12 = vsel %vm590_vm7, %v1303_v56, %v587_v1 }
 0x331   :  { %v596_v21 = vsel %vm593_vm8, %v595_v15, %v591_v12  ;;  %v576_v42 = vsel %vm1780_vm12, %v1748_v59, %v572_v23 }
 0x332   :  { %v597_v37 = vmul.f32 %v1704_v7, %v596_v21  ;;  %v581_v52 = vsel %vm578_vm1, %v580_v45, %v576_v42 }
 0x337   :  { %v1745_v57 = vpop.xlane.xlu2 %539 }
 0x338   :  { %1306 = vrcp.f32 %v1745_v57  ;;  %v609_v46 = vand.u32 2147483648, %v1745_v57  ;;  %vm603_vm2 = vweird.f32 %v1745_v57  ;;  %v607_v50 = vand.u32 2147483647, %v1745_v57 }
 0x33a   :  { %v610_v56 = vor.u32 1.1754944e-38, %v609_v46  ;;  %vm608_vm6 = vcmp.eq.f32.partialorder %v607_v50, 8.507059e+37 }
 0x33e   :  { %v1752_v63 = vpop.eup %1306 }
 0x33f   :  { %v549_v60 = vpop.xlane.xlu1 %548  ;;  %v599_v6 = vmul.f32 %v1752_v63, %v1745_v57  ;;  %vm604_vm14 = vweird.f32 %v1752_v63 }
 0x340   :  { %1308 = vrcp.f32 %v549_v60  ;;  %v654_v40 = vand.u32 2147483648, %v549_v60  ;;  %vm648_vm13 = vweird.f32 %v549_v60  ;;  %v652_v41 = vand.u32 2147483647, %v549_v60  ;;  %vm605_vm3 = vmor %vm603_vm2, %vm604_vm14 }
 0x341   :  { %v600_v18 = vsub.f32 1.0, %v599_v6 }
 0x342   :  { %v655_v51 = vor.u32 1.1754944e-38, %v654_v40  ;;  %vm653_vm5 = vcmp.eq.f32.partialorder %v652_v41, 8.507059e+37 }
 0x343   :  { %v601_v29 = vmul.f32 %v1752_v63, %v600_v18 }
 0x345   :  { %v1754_v2 = vpop.xlane.xlu2 %545  ;;  %v602_v43 = vadd.f32 %v1752_v63, %v601_v29 }
 0x346   :  { %v1309_v3 = vpop.eup %1308  ;;  %1310 = vrcp.f32 %v1754_v2  ;;  %vm633_vm8 = vweird.f32 %v1754_v2  ;;  %v639_v0 = vand.u32 2147483648, %v1754_v2  ;;  %v637_v5 = vand.u32 2147483647, %v1754_v2 }
 0x347   :  { %v644_v9 = vmul.f32 %v1309_v3, %v549_v60  ;;  %v1759_v10 = vpop.xlane.xlu0 %551  ;;  %vm649_vm11 = vweird.f32 %v1309_v3  ;;  %v606_v54 = vsel %vm605_vm3, %v1752_v63, %v602_v43  ;;  %v582_v60 = vmul.f32 %v1700_v4, %v581_v52 }
 0x348   :  { %1312 = vrcp.f32 %v1759_v10  ;;  %vm650_vm15 = vmor %vm648_vm13, %vm649_vm11  ;;  %v611_v59 = vsel %vm608_vm6, %v610_v56, %v606_v54  ;;  %v669_v1 = vand.u32 2147483648, %v1759_v10  ;;  %vm663_vm11 = vweird.f32 %v1759_v10  ;;  %v916_v56 = vld [vmem:[#allocation5 + $0x18] sm:$0xff] }
 0x349   :  { %v645_v13 = vsub.f32 1.0, %v644_v9  ;;  %v667_v6 = vand.u32 2147483647, %v1759_v10  ;;  %v612_v8 = vmul.f32 %v1708_v14, %v611_v59  ;;  %v640_v14 = vor.u32 1.1754944e-38, %v639_v0 }
 0x34a   :  { %vm638_vm13 = vcmp.eq.f32.partialorder %v637_v5, 8.507059e+37  ;;  %v917_v9 = vperm.slane %v1585_v31, 3 }
 0x34b   :  { %v646_v19 = vmul.f32 %v1309_v3, %v645_v13  ;;  %vm668_vm14 = vcmp.eq.f32.partialorder %v667_v6, 8.507059e+37 }
 0x34c   :  { %v1763_v20 = vpop.eup %1310 }
 0x34d   :  { %v1768_v24 = vpop.permute.xlu2 %1274  ;;  %v629_v32 = vmul.f32 %v1763_v20, %v1754_v2  ;;  %v647_v34 = vadd.f32 %v1309_v3, %v646_v19  ;;  %vm634_vm7 = vweird.f32 %v1763_v20 }
 0x34e   :  { %v1770_v26 = vpop.eup %1312  ;;  %v1276_v33 = vunpack.i.l.bf16 %v1768_v24  ;;  %vm1807_vm10 = vmor %vm633_vm8, %vm634_vm7  ;;  %v1277_v11 = vunpack.i.h.bf16 %v1768_v24 }
 0x34f   :  { %v659_v35 = vmul.f32 %v1770_v26, %v1759_v10  ;;  %v630_v7 = vsub.f32 1.0, %v629_v32  ;;  %v651_v48 = vsel %vm650_vm15, %v1309_v3, %v647_v34  ;;  %vm664_vm9 = vweird.f32 %v1770_v26 }
 0x350   :  { %746 = vmatpush.msra.mxu1 %v1276_v33  ;;  %v656_v17 = vsel %vm653_vm5, %v655_v51, %v651_v48  ;;  %vm1815_vm12 = vmor %vm663_vm11, %vm664_vm9  ;;  %v670_v10 = vor.u32 1.1754944e-38, %v669_v1  ;;  %vm907_vm9 = vcmask 130048  }
 0x351   :  { %1223 = vmatmul.msk.f32.vlgmr.msra.gmra.mxu1 %vm250_vm4, %v597_v37  ;;  %v660_v44 = vsub.f32 1.0, %v659_v35  ;;  %v631_v22 = vmul.f32 %v1763_v20, %v630_v7  ;;  %v657_v57 = vmul.f32 %v1713_v25, %v656_v17 }
 0x353   :  { %v661_v55 = vmul.f32 %v1770_v26, %v660_v44  ;;  %v632_v61 = vadd.f32 %v1763_v20, %v631_v22 }
 0x355   :  { %v662_v62 = vadd.f32 %v1770_v26, %v661_v55  ;;  %v636_v13 = vsel %vm1807_vm10, %v1763_v20, %v632_v61  ;;  %vm910_vm10 = vcmask 195584  }
 0x356   :  { %v641_v18 = vsel %vm638_vm13, %v640_v14, %v636_v13 }
 0x357   :  { %v1280_v36 = vpop.permute.xlu1 %1279  ;;  %v666_v2 = vsel %vm1815_vm12, %v1770_v26, %v662_v62  ;;  %v642_v20 = vmul.f32 %v1717_v28, %v641_v18 }
 0x358   :  { %v1282_v58 = vunpack.i.h.bf16 %v1280_v36  ;;  %v1281_v12 = vunpack.i.l.bf16 %v1280_v36  ;;  %v671_v19 = vsel %vm668_vm14, %v670_v10, %v666_v2  ;;  %v914_v36 = vld [vmem:[#allocation5 + $0x8] sm:$0xff] }
 0x359   :  { %v672_v21 = vmul.f32 %v1721_v30, %v671_v19 }
 0x35a   :  { %v1270_v63 = vpop.permute.xlu0 %1269  ;;  %850 = vmatpush.msrb.mxu1 %v1282_v58  ;;  %v913_v58 = vld [vmem:[#allocation5] sm:$0xff] }
 0x35b   :  { %v1271_v3 = vunpack.i.l.bf16 %v1270_v63  ;;  %1227 = vmatmul.msk.f32.vlgmr.msrb.gmra.mxu1 %vm250_vm4, %v657_v57  ;;  %v1272_v25 = vunpack.i.h.bf16 %v1270_v63 }
 0x35d   :  { %720 = vmatpush.msrb.mxu0 %v1272_v25  ;;  %772 = vmatpush.msra.mxu2 %v1271_v3 }
 0x35e   :  { %1222 = vmatmul.msk.f32.vlgmr.msrb.gmra.mxu0 %vm250_vm4, %v582_v60  ;;  %1224 = vmatmul.msk.f32.vlgmr.msra.gmra.mxu2 %vm250_vm4, %v612_v8 }
 0x35f   :  { %824 = vmatpush.msra.mxu0 %v1281_v12  ;;  %876 = vmatpush.msrb.mxu2 %v1277_v11  ;;  %v674_v15 = vpop.permute.xlu1 %673 }
 0x360   :  { %694 = vmatpush.msra.mxu3 %v674_v15 }
 0x366   :  { %1226 = vmatmul.msk.f32.vlgmr.msra.gmra.mxu0 %vm250_vm4, %v642_v20  ;;  %1228 = vmatmul.msk.f32.vlgmr.msrb.gmra.mxu2 %vm250_vm4, %v672_v21 }
 0x367   :  { %v778_v23 = vpop.permute.xlu1 %777 }
 0x368   :  { %798 = vmatpush.msrb.mxu3 %v778_v23 }
 0x385   :  { %v531_v24 = vpop.xlane.xlu0 %530 }
 0x386   :  { %1314 = vrcp.f32 %v531_v24  ;;  %v564_v34 = vand.u32 2147483648, %v531_v24  ;;  %v562_v28 = vand.u32 2147483647, %v531_v24  ;;  %vm558_vm1 = vweird.f32 %v531_v24 }
 0x388   :  { %v543_v26 = vpop.xlane.xlu2 %542  ;;  %v565_v39 = vor.u32 1.1754944e-38, %v564_v34  ;;  %vm563_vm3 = vcmp.eq.f32.partialorder %v562_v28, 8.507059e+37  ;;  %v999_v28 = vld [vmem:[#allocation7 + $0x18] sm:$0xff] }
 0x389   :  { %1316 = vrcp.f32 %v543_v26  ;;  %v624_v7 = vand.u32 2147483648, %v543_v26  ;;  %vm618_vm6 = vweird.f32 %v543_v26  ;;  %v622_v44 = vand.u32 2147483647, %v543_v26  ;;  %1022 = vmatpush.msrb.mxu0 %v999_v28 }
 0x38b   :  { %v625_v48 = vor.u32 1.1754944e-38, %v624_v7  ;;  %vm623_vm8 = vcmp.eq.f32.partialorder %v622_v44, 8.507059e+37 }
 0x38c   :  { %v1315_v27 = vpop.eup %1314 }
 0x38d   :  { %v554_v29 = vmul.f32 %v1315_v27, %v531_v24  ;;  %vm559_vm15 = vweird.f32 %v1315_v27 }
 0x38e   :  { %vm560_vm2 = vmor %vm558_vm1, %vm559_vm15 }
 0x38f   :  { %v1317_v32 = vpop.eup %1316  ;;  %v555_v33 = vsub.f32 1.0, %v554_v29 }
 0x390   :  { %v614_v35 = vmul.f32 %v1317_v32, %v543_v26  ;;  %vm619_vm5 = vweird.f32 %v1317_v32 }
 0x391   :  { %v556_v37 = vmul.f32 %v1315_v27, %v555_v33  ;;  %vm620_vm7 = vmor %vm618_vm6, %vm619_vm5  ;;  %vm1130_vm5 = vcmask 523264  }
 0x392   :  { %v615_v30 = vsub.f32 1.0, %v614_v35 }
 0x393   :  { %v557_v38 = vadd.f32 %v1315_v27, %v556_v37 }
 0x394   :  { %v616_v40 = vmul.f32 %v1317_v32, %v615_v30  ;;  %v998_v30 = vld [vmem:[#allocation7 + $0x10] sm:$0xff] }
 0x395   :  { %v561_v41 = vsel %vm560_vm2, %v1315_v27, %v557_v38  ;;  %1023 = vmatpush.msrb.mxu0 %v998_v30 }
 0x396   :  { %v566_v42 = vsel %vm563_vm3, %v565_v39, %v561_v41  ;;  %v617_v43 = vadd.f32 %v1317_v32, %v616_v40  ;;  %v997_v40 = vld [vmem:[#allocation7 + $0x8] sm:$0xff] }
 0x397   :  { %v567_v45 = vmul.f32 %v1734_v53, %v566_v42  ;;  %1024 = vmatpush.msrb.mxu0 %v997_v40 }
 0x398   :  { %v621_v46 = vsel %vm620_vm7, %v1317_v32, %v617_v43  ;;  %v996_v43 = vld [vmem:[#allocation7] sm:$0xff] }
 0x399   :  { %1221 = vmatmul.msk.f32.vlgmr.msra.gmra.mxu3 %vm250_vm4, %v567_v45  ;;  %v626_v50 = vsel %vm623_vm8, %v625_v48, %v621_v46  ;;  %1025 = vmatpush.msrb.mxu0 %v996_v43 }
 0x39a   :  { %v627_v51 = vmul.f32 %v1738_v16, %v626_v50  ;;  %936 = vmatpush.msra.mxu3 %v916_v56  ;;  %v915_v16 = vld [vmem:[#allocation5 + $0x10] sm:$0xff]  ;;  %v99_v56 = vld [vmem:[#allocation8 + $0x8] sm:$0x1] }
 0x39c   :  { %937 = vmatpush.msra.mxu3 %v915_v16 }
 0x39e   :  { %938 = vmatpush.msra.mxu3 %v914_v36 }
 0x3a0   :  { %939 = vmatpush.msra.mxu3 %v913_v58 }
 0x3a1   :  { %1225 = vmatmul.msk.f32.vlgmr.msrb.gmra.mxu3 %vm250_vm4, %v627_v51 }
 0x3ce   :  { %v748_v52 = vpop.f32.mrf.mxu1 }
 0x3d8   :  { %v852_v54 = vpop.f32.mrf.mxu1 }
 0x3d9   :  { %893 = vrot.lane.b32.xlu2 %v852_v54, %s1491_s1 }
 0x3db   :  { %v722_v17 = vpop.f32.mrf.mxu0 }
 0x3dc   :  { %883 = vrot.lane.b32.xlu1 %v722_v17, %s1481_s18 }
 0x3e1   :  { %v774_v22 = vpop.f32.mrf.mxu2 }
 0x3e2   :  { %899 = vrot.lane.b32.xlu0 %v774_v22, %s1492_s12 }
 0x3e3   :  { %v826_v53 = vpop.f32.mrf.mxu0 }
 0x3e4   :  { %891 = vrot.lane.b32.xlu1 %v748_v52, %s1491_s1 }
 0x3e9   :  { %v878_v55 = vpop.f32.mrf.mxu2 }
 0x3ec   :  { %885 = vrot.lane.b32.xlu1 %v826_v53, %s1481_s18 }
 0x3f4   :  { %901 = vrot.lane.b32.xlu1 %v878_v55, %s1492_s12 }
 0x41c   :  { %v696_v57 = vpop.f32.mrf.mxu3 }
 0x424   :  { %v800_v3 = vpop.f32.mrf.mxu3 }
 0x433   :  { %v894_v4 = vpop.permute.xlu2 %893 }
 0x44e   :  { %v884_v59 = vpop.permute.xlu1 %883 }
 0x44f   :  { %v905_v60 = vsel %vm250_vm4, %v696_v57, %v884_v59 }
 0x454   :  { %v900_v62 = vpop.permute.xlu0 %899 }
 0x456   :  { %v892_v61 = vpop.permute.xlu1 %891 }
 0x457   :  { %v908_v63 = vsel %vm907_vm9, %v905_v60, %v892_v61 }
 0x458   :  { %v911_v0 = vsel %vm910_vm10, %v908_v63, %v900_v62 }
 0x459   :  { %1229 = vmatmul.msk.f32.vlgmr.msra.gmra.mxu3 %vm100_vm0, %v911_v0 }
 0x45e   :  { %v886_v1 = vpop.permute.xlu1 %885 }
 0x45f   :  { %v906_v25 = vsel %vm250_vm4, %v800_v3, %v886_v1 }
 0x460   :  { %v909_v6 = vsel %vm907_vm9, %v906_v25, %v894_v4 }
 0x466   :  { %v902_v5 = vpop.permute.xlu1 %901 }
 0x467   :  { %v912_v8 = vsel %vm910_vm10, %v909_v6, %v902_v5  ;;  %v1128_v5 = vld [vmem:[%s1924_s5 + $0x38] sm:$0xff] }
 0x468   :  { %1230 = vmatmul.msk.f32.gmra.mxu3 %vm100_vm0, %v912_v8  ;;  %1145 = vmatpush.msra.mxu1 %v1128_v5 }
 0x4dc   :  { %v941_v11 = vpop.f32.mrf.mxu3 }
 0x4dd   :  { %v942_v12 = vadd.f32 %v941_v11, %v917_v9  ;;  %v1127_v11 = vld [vmem:[%s1924_s5 + $0x30] sm:$0xff] }
 0x4de   :  { %1146 = vmatpush.msra.mxu1 %v1127_v11 }
 0x4df   :  { %v947_v13 = vadd.f32 %v942_v12, %v1590_v47 }
 0x4e1   :  { %v959_v10 = vmul.f32 %v947_v13, %v947_v13  ;;  %v949_v18 = vsel %vm100_vm0, %v947_v13, 0.0 }
 0x4e3   :  { %v961_v23 = vsel %vm100_vm0, %v959_v10, 0.0 }
 0x4eb   :  { %v944_v2 = vpop.f32.mrf.mxu3 }
 0x4ec   :  { %v945_v14 = vadd.f32 %v944_v2, %v917_v9 }
 0x4ee   :  { %v948_v15 = vadd.f32 %v945_v14, %v1594_v49  ;;  %v1126_v14 = vld [vmem:[%s1924_s5 + $0x28] sm:$0xff] }
 0x4ef   :  { %1147 = vmatpush.msra.mxu1 %v1126_v14 }
 0x4f0   :  { %v950_v19 = vsel %vm100_vm0, %v948_v15, 0.0  ;;  %v960_v20 = vmul.f32 %v948_v15, %v948_v15 }
 0x4f1   :  { %v951_v21 = vadd.f32 %v950_v19, %v949_v18  ;;  %v1125_v19 = vld [vmem:[%s1924_s5 + $0x20] sm:$0xff] }
 0x4f2   :  { %v962_v24 = vsel %vm100_vm0, %v960_v20, 0.0  ;;  %1148 = vmatpush.msra.mxu1 %v1125_v19 }
 0x4f3   :  { %v952_v26 = vrot.slane %v951_v21, 4  ;;  %v963_v27 = vadd.f32 %v962_v24, %v961_v23  ;;  %v1124_v24 = vld [vmem:[%s1924_s5 + $0x18] sm:$0xff] }
 0x4f4   :  { %1149 = vmatpush.msra.mxu1 %v1124_v24 }
 0x4f5   :  { %v953_v29 = vadd.f32 %v952_v26, %v951_v21  ;;  %v964_v32 = vrot.slane %v963_v27, 4 }
 0x4f7   :  { %v954_v47 = vrot.slane %v953_v29, 2  ;;  %v965_v33 = vadd.f32 %v964_v32, %v963_v27  ;;  %v1123_v32 = vld [vmem:[%s1924_s5 + $0x10] sm:$0xff] }
 0x4f8   :  { %1150 = vmatpush.msra.mxu1 %v1123_v32 }
 0x4f9   :  { %v955_v34 = vadd.f32 %v954_v47, %v953_v29  ;;  %v966_v35 = vrot.slane %v965_v33, 2 }
 0x4fb   :  { %v956_v37 = vrot.slane %v955_v34, 1  ;;  %v967_v49 = vadd.f32 %v966_v35, %v965_v33 }
 0x4fd   :  { %v957_v38 = vadd.f32 %v956_v37, %v955_v34  ;;  %v968_v39 = vrot.slane %v967_v49, 1  ;;  %v1122_v37 = vld [vmem:[%s1924_s5 + $0x8] sm:$0xff] }
 0x4fe   :  { %1151 = vmatpush.msra.mxu1 %v1122_v37 }
 0x4ff   :  { %v958_v41 = vmul.f32 0.0625, %v957_v38  ;;  %v969_v42 = vadd.f32 %v968_v39, %v967_v49  ;;  %v1121_v38 = vld [vmem:[%s1924_s5] sm:$0xff]  ;;  %s1493_s5 = smov [#allocation11]  }
 0x500   :  { %1152 = vmatpush.msra.mxu1 %v1121_v38  ;;  %s1181_s6 = sshll.u32 %s1493_s5, 4  ;;  %s1182_s6 = int_to_ptr.vmem [resolvable:$true] %s1181_s6 }
 0x501   :  { %v970_v7 = vmul.f32 0.0625, %v969_v42  ;;  %v971_v44 = vmul.f32 %v958_v41, %v958_v41  ;;  %1189 = dma.vmem_to_hbm [thread:$0]  %s1182_s6, 1024, %s1184_s30, [#allocation12], %s1480_s17, %s1480_s17, %s1481_s18  }
 0x503   :  { %v972_v45 = vsub.f32 %v970_v7, %v971_v44 }
 0x505   :  { %v973_v46 = vadd.f32 1e-05, %v972_v45 }
 0x507   :  { %1318 = vrsqrt.f32 %v973_v46  ;;  %vm980_vm11 = vweird.f32 %v973_v46 }
 0x50d   :  { %v1319_v48 = vpop.eup %1318 }
 0x50e   :  { %v975_v50 = vmul.f32 %v1319_v48, %v973_v46  ;;  %vm981_vm4 = vweird.f32 %v1319_v48 }
 0x50f   :  { %vm982_vm12 = vmor %vm980_vm11, %vm981_vm4 }
 0x510   :  { %v976_v51 = vmul.f32 %v1319_v48, %v975_v50 }
 0x512   :  { %v977_v52 = vmul.f32 0.5, %v976_v51 }
 0x514   :  { %v978_v54 = vsub.f32 1.5, %v977_v52 }
 0x516   :  { %v979_v17 = vmul.f32 %v1319_v48, %v978_v54 }
 0x518   :  { %v983_v22 = vsel %vm982_vm12, %v1319_v48, %v979_v17 }
 0x519   :  { %v984_v53 = vmul.f32 %v983_v22, %v1585_v31  ;;  %v1283_v31 = vld [vmem:[%s1926_s7] ss:$0 sm:$0xff] }
 0x51b   :  { %v988_v55 = vmul.f32 %v984_v53, %v958_v41  ;;  %v985_v16 = vperm.slane %v984_v53, 7 }
 0x51d   :  { %v990_v36 = vrot.slane %v988_v55, 7  ;;  %v986_v59 = vmul.f32 %v985_v16, %v947_v13  ;;  %v987_v61 = vmul.f32 %v985_v16, %v948_v15 }
 0x51f   :  { %v992_v58 = vsub.f32 %v99_v56, %v990_v36 }
 0x521   :  { %v993_v57 = vperm.slane %v992_v58, 0 }
 0x523   :  { %v1850_v60 = vadd.f32 %v993_v57, %v986_v59  ;;  %v1854_v62 = vadd.f32 %v993_v57, %v987_v61 }
 0x525   :  { %1231 = vmatmul.msk.f32.vlgmr.msrb.gmra.mxu0 %vm100_vm0, %v1850_v60 }
 0x52d   :  { %1232 = vmatmul.msk.f32.gmra.mxu0 %vm100_vm0, %v1854_v62 }
 0x5a2   :  { %v1027_v63 = vpop.f32.mrf.mxu0 }
 0x5a3   :  { %v1861_v0 = vadd.f32 %v1283_v31, %v1027_v63 }
 0x5a5   :  { %v1864_v1 = vmul.f32 0.70710677, %v1861_v0 }
 0x5a7   :  { %v1037_v3 = vmul.f32 %v1864_v1, %v1864_v1 }
 0x5a9   :  { %v1038_v25 = vmin.f32 %v1037_v3, 16.0 }
 0x5aa   :  { %v1030_v4 = vpop.f32.mrf.mxu0 }
 0x5ab   :  { %v1039_v6 = vmul.f32 2.1237322e-06, %v1038_v25  ;;  %v1050_v8 = vmul.f32 3.8918573e-05, %v1038_v25  ;;  %v1871_v9 = vadd.f32 %v1283_v31, %v1030_v4 }
 0x5ad   :  { %v1040_v12 = vadd.f32 0.00028619796, %v1039_v6  ;;  %v1051_v13 = vadd.f32 0.001143296, %v1050_v8  ;;  %v1877_v2 = vmul.f32 0.70710677, %v1871_v9 }
 0x5af   :  { %v1041_v10 = vmul.f32 %v1040_v12, %v1038_v25  ;;  %v1052_v15 = vmul.f32 %v1051_v13, %v1038_v25  ;;  %v1077_v18 = vmul.f32 %v1877_v2, %v1877_v2 }
 0x5b1   :  { %v1053_v20 = vadd.f32 0.014752088, %v1052_v15  ;;  %v1042_v21 = vadd.f32 0.0036580483, %v1041_v10  ;;  %v1078_v23 = vmin.f32 %v1077_v18, 16.0 }
 0x5b3   :  { %v1054_v26 = vmul.f32 %v1053_v20, %v1038_v25  ;;  %v1079_v27 = vmul.f32 2.1237322e-06, %v1078_v23  ;;  %v1090_v29 = vmul.f32 3.8918573e-05, %v1078_v23  ;;  %v1043_v33 = vmul.f32 %v1042_v21, %v1038_v25 }
 0x5b4   :  { %v1033_v20 = vmul.f32 0.5, %v1861_v0  ;;  %v1324_v0 = vld [vmem:[#allocation8] sm:$0xff] }
 0x5b5   :  { %v1055_v47 = vadd.f32 0.112945676, %v1054_v26  ;;  %v1080_v34 = vadd.f32 0.00028619796, %v1079_v27  ;;  %v1091_v35 = vadd.f32 0.001143296, %v1090_v29 }
 0x5b6   :  { %v1044_v40 = vadd.f32 0.05243302, %v1043_v33  ;;  %v1034_v33 = vmul.f32 0.5, %v1871_v9 }
 0x5b7   :  { %v1056_v49 = vmul.f32 %v1055_v47, %v1038_v25  ;;  %v1081_v28 = vmul.f32 %v1080_v34, %v1078_v23  ;;  %v1092_v30 = vmul.f32 %v1091_v35, %v1078_v23 }
 0x5b8   :  { %v1045_v45 = vmul.f32 %v1044_v40, %v1038_v25 }
 0x5b9   :  { %v1057_v39 = vadd.f32 0.4994258, %v1056_v49  ;;  %v1093_v41 = vadd.f32 0.014752088, %v1092_v30  ;;  %v1082_v43 = vadd.f32 0.0036580483, %v1081_v28 }
 0x5ba   :  { %v1046_v51 = vadd.f32 0.18741608, %v1045_v45 }
 0x5bb   :  { %v1058_v42 = vmul.f32 %v1057_v39, %v1038_v25  ;;  %v1094_v7 = vmul.f32 %v1093_v41, %v1078_v23  ;;  %v1083_v48 = vmul.f32 %v1082_v43, %v1078_v23 }
 0x5bc   :  { %v1047_v53 = vmul.f32 %v1046_v51, %v1038_v25 }
 0x5bd   :  { %v1059_v44 = vadd.f32 1.0, %v1058_v42  ;;  %v1095_v46 = vadd.f32 0.112945676, %v1094_v7  ;;  %v1084_v54 = vadd.f32 0.05243302, %v1083_v48 }
 0x5be   :  { %v1048_v59 = vadd.f32 1.1283791, %v1047_v53 }
 0x5bf   :  { %1320 = vrcp.f32 %v1059_v44  ;;  %v1096_v50 = vmul.f32 %v1095_v46, %v1078_v23  ;;  %v1085_v16 = vmul.f32 %v1084_v54, %v1078_v23  ;;  %v1071_v58 = vand.u32 2147483648, %v1059_v44 }
 0x5c0   :  { %v1069_v61 = vand.u32 2147483647, %v1059_v44  ;;  %vm1065_vm14 = vweird.f32 %v1059_v44  ;;  %v1049_v5 = vmul.f32 %v1048_v59, %v1864_v1 }
 0x5c1   :  { %v1097_v52 = vadd.f32 0.4994258, %v1096_v50  ;;  %v1086_v31 = vadd.f32 0.18741608, %v1085_v16  ;;  %v1072_v3 = vor.u32 1.1754944e-38, %v1071_v58 }
 0x5c2   :  { %vm1070_vm1 = vcmp.eq.f32.partialorder %v1069_v61, 8.507059e+37 }
 0x5c3   :  { %v1098_v17 = vmul.f32 %v1097_v52, %v1078_v23  ;;  %v1087_v8 = vmul.f32 %v1086_v31, %v1078_v23 }
 0x5c5   :  { %v1321_v22 = vpop.eup %1320  ;;  %v1099_v56 = vadd.f32 1.0, %v1098_v17  ;;  %v1088_v15 = vadd.f32 1.1283791, %v1087_v8 }
 0x5c6   :  { %v1061_v55 = vmul.f32 %v1321_v22, %v1059_v44  ;;  %vm1066_vm13 = vweird.f32 %v1321_v22 }
 0x5c7   :  { %1322 = vrcp.f32 %v1099_v56  ;;  %vm1067_vm15 = vmor %vm1065_vm14, %vm1066_vm13  ;;  %v1111_v10 = vand.u32 2147483648, %v1099_v56  ;;  %v1109_v19 = vand.u32 2147483647, %v1099_v56  ;;  %vm1105_vm3 = vweird.f32 %v1099_v56 }
 0x5c8   :  { %v1062_v36 = vsub.f32 1.0, %v1061_v55  ;;  %v1089_v23 = vmul.f32 %v1088_v15, %v1877_v2  ;;  %v1129_v2 = vperm.slane %v1324_v0, 4 }
 0x5c9   :  { %v1112_v26 = vor.u32 1.1754944e-38, %v1111_v10  ;;  %vm1110_vm7 = vcmp.eq.f32.partialorder %v1109_v19, 8.507059e+37 }
 0x5ca   :  { %v1063_v57 = vmul.f32 %v1321_v22, %v1062_v36 }
 0x5cc   :  { %v1064_v63 = vadd.f32 %v1321_v22, %v1063_v57 }
 0x5cd   :  { %v1323_v4 = vpop.eup %1322 }
 0x5ce   :  { %v1068_v6 = vsel %vm1067_vm15, %v1321_v22, %v1064_v63  ;;  %v1101_v11 = vmul.f32 %v1323_v4, %v1099_v56  ;;  %vm1106_vm2 = vweird.f32 %v1323_v4 }
 0x5cf   :  { %v1073_v25 = vsel %vm1070_vm1, %v1072_v3, %v1068_v6  ;;  %vm1107_vm6 = vmor %vm1105_vm3, %vm1106_vm2 }
 0x5d0   :  { %v1074_v12 = vmul.f32 %v1073_v25, %v1049_v5  ;;  %v1102_v13 = vsub.f32 1.0, %v1101_v11 }
 0x5d2   :  { %v1233_v14 = vclamps-f32 %v1074_v12, 1.0  ;;  %v1103_v18 = vmul.f32 %v1323_v4, %v1102_v13 }
 0x5d4   :  { %v1117_v21 = vadd.f32 1.0, %v1233_v14  ;;  %v1104_v24 = vadd.f32 %v1323_v4, %v1103_v18 }
 0x5d6   :  { %v1119_v1 = vmul.f32 %v1117_v21, %v1033_v20  ;;  %v1108_v27 = vsel %vm1107_vm6, %v1323_v4, %v1104_v24 }
 0x5d7   :  { %v1113_v29 = vsel %vm1110_vm7, %v1112_v26, %v1108_v27 }
 0x5d8   :  { %1235 = vmatmul.msk.f32.vlgmr.msra.gmra.mxu1 %vm1130_vm5, %v1119_v1  ;;  %v1114_v32 = vmul.f32 %v1113_v29, %v1089_v23 }
 0x5da   :  { %v1234_v47 = vclamps-f32 %v1114_v32, 1.0 }
 0x5dc   :  { %v1118_v34 = vadd.f32 1.0, %v1234_v47 }
 0x5de   :  { %v1120_v35 = vmul.f32 %v1118_v34, %v1034_v33 }
 0x5e0   :  { %1236 = vmatmul.msk.f32.gmra.mxu1 %vm1130_vm5, %v1120_v35 }
 0x655   :  { %v1154_v37 = vpop.f32.mrf.mxu1 }
 0x656   :  { %v1155_v49 = vadd.f32 %v1154_v37, %v1129_v2 }
 0x658   :  { %v1160_v9 = vadd.f32 %v1155_v49, %v1850_v60 }
 0x65a   :  { %1162 = vst.msk [vmem:[#allocation10] sm:$0xff] %vm100_vm0, %v1160_v9 }
 0x65d   :  { %v1157_v28 = vpop.f32.mrf.mxu1 }
 0x65e   :  { %v1158_v30 = vadd.f32 %v1157_v28, %v1129_v2 }
 0x660   :  { %v1161_v38 = vadd.f32 %v1158_v30, %v1854_v62 }
 0x662   :  { %1163 = vst.msk [vmem:[#allocation10 + $0x8] sm:$0xff] %vm100_vm0, %v1161_v38 }
 0x663   :  { %1176 = dma.vmem_to_hbm [thread:$0]  %s1169_s11, 256, %s1171_s9, [#allocation4], %s1480_s17, %s1480_s17, %s1481_s18  }
 0x664   :  { %1475 = dma.done.wait [#allocation4], 256  }
 0x665   :  { %1476 = vsyncadd [#allocation4], 4294967040 }
 0x666   :  { %1477 = dma.done.wait [#allocation12], 1024  }
 0x667   :  { %1478 = vsyncadd [#allocation12], 4294966272 }
 0x668   :  { %1198 = vsyncpa [#allocation3], 1 }
 0x669   :  { %1199 = vsyncpa [#allocation6], 1 }
 0x66a   :  { %1200 = vsyncpa [#allocation9], 1 }
 0x66b   :  { %1201 = vsyncpa [#allocation4], 1 }
 0x66c   :  { %1202 = vsyncpa [#allocation12], 1 }

</bundles_post_ra>
